<compile_context>
chip_gen: v6e
topology: v6e:2x2x1
jax: 0.10.0
libtpu: 0.0.40
codegen_flags: <defaults>
</compile_context>

<pallas_src>
import functools

import jax
import jax.numpy as jnp
from jax.experimental import pallas as pl
from jax.experimental.pallas import tpu as pltpu

_LANE = 128
_SUBLANE = 8


def _focal_loss_kernel(preds_ref, labels_ref, out_ref, *,
                       gamma, n_valid, tile, class_axis):
    """One grid step: focal-loss partial sum for one block of rows.

    class_axis == 1: preds block (tile, C), labels (tile, 1)   [row-major]
    class_axis == 0: preds block (C, tile), labels (1, tile)   [rows on lanes]
    """
    i = pl.program_id(0)

    x = preds_ref[...].astype(jnp.float32)
    # numerically stable log-softmax pieces; full logp never materialized
    m = jnp.max(x, axis=class_axis, keepdims=True)
    sh = x - m
    lse = jnp.log(jnp.sum(jnp.exp(sh), axis=class_axis, keepdims=True))

    labels = labels_ref[...]                                   # int32
    cls = jax.lax.broadcasted_iota(jnp.int32, sh.shape, class_axis)
    sel = cls == labels                                        # one-hot gather
    x_l = jnp.sum(jnp.where(sel, sh, 0.0), axis=class_axis, keepdims=True)
    logp_l = x_l - lse                                         # gathered log-softmax
    p_l = jnp.exp(logp_l)

    one_m_p = 1.0 - p_l
    if isinstance(gamma, int):
        focal = jax.lax.integer_pow(one_m_p, gamma)            # VALU, no exp/log pow
    else:
        focal = one_m_p ** gamma
    loss = -focal * logp_l

    # mask rows past the true row count (edge block of the grid is padded)
    row_axis = 1 - class_axis
    ridx = i * tile + jax.lax.broadcasted_iota(jnp.int32, loss.shape, row_axis)
    loss = jnp.where(ridx < n_valid, loss, 0.0)

    out_ref[0, 0] = jnp.sum(loss)                              # per-block partial sum


def _pick_row_tile(n, c, rows_on_lanes, budget_bytes=4 << 20):
    """Row tile whose f32 (rows x C) slab stays within ~4 MiB.

    Double-buffered inputs + in-kernel f32 temporaries then stay well inside
    the vmem_limit on every chip while amortizing per-grid-step overhead.
    """
    if rows_on_lanes:
        align, max_tile = _LANE, 32768        # rows live on the lane axis
    else:
        align, max_tile = _SUBLANE, 2048      # rows live on the sublane axis
    t = budget_bytes // (4 * max(c, 1))
    t = max(align, min(max_tile, t))
    t = (t // align) * align
    if n <= t:
        return n                              # one block equal to the full row extent
    return int(t)


def multi_class_loss(preds, labels, gamma=2, tile=None):
    """Pallas focal loss. preds: (..., C) float (f32/bf16), labels: (...) int."""
    c = preds.shape[-1]
    preds2d = preds.reshape(-1, c)            # keep dtype: bf16 streams as bf16
    labels1d = labels.reshape(-1).astype(jnp.int32)
    n = preds2d.shape[0]

    # Small C -> put rows on the 128-wide lane axis (one cheap XLA transpose)
    # so exp/sum/compare run lane-dense instead of C/128 utilized.
    rows_on_lanes = c < _LANE

    if tile is None:
        tile = _pick_row_tile(n, c, rows_on_lanes)
    num_blocks = pl.cdiv(n, tile)

    if rows_on_lanes:
        x = preds2d.T                         # (C, N)
        lab = labels1d.reshape(1, -1)         # (1, N)
        in_specs = [
            pl.BlockSpec((c, tile), lambda i: (0, i)),
            pl.BlockSpec((1, tile), lambda i: (0, i)),
        ]
        class_axis = 0
    else:
        x = preds2d                           # (N, C), already lane-dense
        lab = labels1d.reshape(-1, 1)         # (N, 1)
        in_specs = [
            pl.BlockSpec((tile, c), lambda i: (i, 0)),
            pl.BlockSpec((tile, 1), lambda i: (i, 0)),
        ]
        class_axis = 1

    kernel = functools.partial(
        _focal_loss_kernel, gamma=gamma, n_valid=n, tile=tile,
        class_axis=class_axis)

    partials = pl.pallas_call(
        kernel,
        out_shape=jax.ShapeDtypeStruct((num_blocks, 1), jnp.float32),
        grid_spec=pltpu.PrefetchScalarGridSpec(
            num_scalar_prefetch=0,
            grid=(num_blocks,),
            in_specs=in_specs,
            out_specs=pl.BlockSpec((1, 1), lambda i: (i, 0),
                                   memory_space=pltpu.SMEM),
        ),
        compiler_params=pltpu.CompilerParams(
            dimension_semantics=("parallel",),      # independent blocks: 2 TCs on v7x
            vmem_limit_bytes=48 * 1024 * 1024,      # above 16/32 MiB defaults, < 64 MiB
        ),
    )(x, lab)

    # TODO(synk): for C just below 128 the transposed path pays sublane padding
    # (C -> next multiple of 8); a per-C threshold sweep could refine the cutover.
    return jnp.sum(partials) / jnp.float32(n)


def _reference(preds, labels, gamma=2):
    c = preds.shape[-1]
    preds2d = preds.reshape(-1, c).astype(jnp.float32)
    labels1d = labels.reshape(-1).astype(jnp.int32)
    logp = jax.nn.log_softmax(preds2d, axis=1)
    logp_l = jnp.take_along_axis(logp, labels1d[:, None], axis=1)
    p_l = jnp.exp(logp_l)
    return jnp.mean(-((1.0 - p_l) ** gamma) * logp_l)


if __name__ == "__main__":
    key = jax.random.PRNGKey(0)
    k1, k2, k3, k4, k5, k6, k7, k8 = jax.random.split(key, 8)

    # Case 1: small C (lane-dense transposed path), single block.
    N, C = 16, 10
    preds = jax.random.normal(k1, (N, C), dtype=jnp.float32)
    labels = jax.random.randint(k2, (N,), 0, C, dtype=jnp.int32)
    loss = jax.block_until_ready(multi_class_loss(preds, labels, gamma=2))
    ref = _reference(preds, labels, gamma=2)
    assert jnp.allclose(loss, ref, atol=1e-5, rtol=1e-5), (loss, ref)

    # Case 2: bf16 stream, row count not a multiple of anything.
    N2, C2 = 37, 12
    preds2 = jax.random.normal(k3, (N2, C2), dtype=jnp.bfloat16)
    labels2 = jax.random.randint(k4, (N2,), 0, C2, dtype=jnp.int32)
    loss2 = jax.block_until_ready(multi_class_loss(preds2, labels2, gamma=2))
    ref2 = _reference(preds2, labels2, gamma=2)
    assert jnp.allclose(loss2, ref2, atol=5e-4, rtol=5e-4), (loss2, ref2)

    # Case 3: C >= 128 -> row-major path (no transpose), single block.
    N3, C3 = 24, 160
    preds3 = jax.random.normal(k5, (N3, C3), dtype=jnp.float32)
    labels3 = jax.random.randint(k6, (N3,), 0, C3, dtype=jnp.int32)
    loss3 = jax.block_until_ready(multi_class_loss(preds3, labels3, gamma=2))
    ref3 = _reference(preds3, labels3, gamma=2)
    assert jnp.allclose(loss3, ref3, atol=1e-5, rtol=1e-5), (loss3, ref3)

    # Case 4: multi-block grids with ragged edge blocks (both layouts, no padding copy).
    N4, C4 = 300, 10
    preds4 = jax.random.normal(k7, (N4, C4), dtype=jnp.float32)
    labels4 = jax.random.randint(k8, (N4,), 0, C4, dtype=jnp.int32)
    loss4 = jax.block_until_ready(multi_class_loss(preds4, labels4, gamma=2, tile=128))
    ref4 = _reference(preds4, labels4, gamma=2)
    assert jnp.allclose(loss4, ref4, atol=1e-5, rtol=1e-5), (loss4, ref4)

    loss5 = jax.block_until_ready(multi_class_loss(preds3, labels3, gamma=2, tile=16))
    assert jnp.allclose(loss5, ref3, atol=1e-5, rtol=1e-5), (loss5, ref3)

    print("KERNEL_OK")
</pallas_src>

<mosaic_0001>
module attributes {stable_mosaic.version = 11 : i64} {
  func.func @_focal_loss_kernel(%arg0: i32, %arg1: memref<10x16xf32, #tpu.memory_space<vmem>>, %arg2: memref<1x16xi32, #tpu.memory_space<vmem>>, %arg3: memref<1x1xf32, #tpu.memory_space<smem>>) attributes {dimension_semantics = [#tpu.dimension_semantics<parallel>], iteration_bounds = array<i64: 1>, scalar_prefetch = 0 : i64, scratch_operands = 0 : i64, tpu.core_type = #tpu.core_type<tc>, window_params = [{transform_indices = @transform_0, window_bounds = array<i64: 10, 16>}, {transform_indices = @transform_1, window_bounds = array<i64: 1, 16>}, {transform_indices = @transform_2, window_bounds = array<i64: 1, 1>}]} {
    %c0 = arith.constant 0 : index
    %c0_0 = arith.constant 0 : index
    %0 = vector.load %arg1[%c0, %c0_0] : memref<10x16xf32, #tpu.memory_space<vmem>>, vector<10x16xf32>
    %cst = arith.constant dense<0xFF800000> : vector<16xf32>
    %1 = vector.multi_reduction <maximumf>, %0, %cst [0] : vector<10x16xf32> to vector<16xf32>
    %2 = vector.shape_cast %1 : vector<16xf32> to vector<1x16xf32>
    %3 = vector.broadcast %2 : vector<1x16xf32> to vector<10x16xf32>
    %4 = arith.subf %0, %3 : vector<10x16xf32>
    %5 = math.exp %4 : vector<10x16xf32>
    %cst_1 = arith.constant dense<0.000000e+00> : vector<16xf32>
    %6 = vector.multi_reduction <add>, %5, %cst_1 [0] : vector<10x16xf32> to vector<16xf32>
    %7 = vector.shape_cast %6 : vector<16xf32> to vector<1x16xf32>
    %8 = math.log %7 : vector<1x16xf32>
    %c0_2 = arith.constant 0 : index
    %c0_3 = arith.constant 0 : index
    %9 = vector.load %arg2[%c0_2, %c0_3] : memref<1x16xi32, #tpu.memory_space<vmem>>, vector<1x16xi32>
    %10 = tpu.iota {dimensions = array<i32: 0>} : vector<10x16xi32>
    %11 = vector.broadcast %9 : vector<1x16xi32> to vector<10x16xi32>
    %12 = arith.cmpi eq, %10, %11 : vector<10x16xi32>
    %cst_4 = arith.constant 0.000000e+00 : f32
    %13 = vector.broadcast %cst_4 : f32 to vector<10x16xf32>
    %14 = arith.select %12, %4, %13 : vector<10x16xi1>, vector<10x16xf32>
    %cst_5 = arith.constant dense<0.000000e+00> : vector<16xf32>
    %15 = vector.multi_reduction <add>, %14, %cst_5 [0] : vector<10x16xf32> to vector<16xf32>
    %16 = vector.shape_cast %15 : vector<16xf32> to vector<1x16xf32>
    %17 = arith.subf %16, %8 : vector<1x16xf32>
    %18 = math.exp %17 : vector<1x16xf32>
    %cst_6 = arith.constant 1.000000e+00 : f32
    %19 = vector.broadcast %cst_6 : f32 to vector<1x16xf32>
    %20 = arith.subf %19, %18 : vector<1x16xf32>
    %21 = arith.mulf %20, %20 : vector<1x16xf32>
    %cst_7 = arith.constant 0.000000e+00 : f32
    %22 = vector.broadcast %cst_7 : f32 to vector<1x16xf32>
    %23 = arith.subf %22, %21 : vector<1x16xf32>
    %24 = arith.mulf %23, %17 : vector<1x16xf32>
    %c16_i32 = arith.constant 16 : i32
    %25 = arith.muli %arg0, %c16_i32 : i32
    %26 = tpu.iota {dimensions = array<i32: 1>} : vector<1x16xi32>
    %27 = vector.broadcast %25 : i32 to vector<1x16xi32>
    %28 = arith.addi %27, %26 : vector<1x16xi32>
    %c16_i32_8 = arith.constant 16 : i32
    %29 = vector.broadcast %c16_i32_8 : i32 to vector<1x16xi32>
    %30 = arith.cmpi slt, %28, %29 : vector<1x16xi32>
    %cst_9 = arith.constant 0.000000e+00 : f32
    %31 = vector.broadcast %cst_9 : f32 to vector<1x16xf32>
    %32 = arith.select %30, %24, %31 : vector<1x16xi1>, vector<1x16xf32>
    %33 = vector.shape_cast %32 : vector<1x16xf32> to vector<1x1x16xf32>
    %cst_10 = arith.constant dense<0.000000e+00> : vector<1xf32>
    %34 = vector.multi_reduction <add>, %33, %cst_10 [1, 2] : vector<1x1x16xf32> to vector<1xf32>
    %35 = vector.shape_cast %34 : vector<1xf32> to vector<1x1x1xf32>
    %36 = vector.extract %35[0, 0, 0] : f32 from vector<1x1x1xf32>
    %c0_11 = arith.constant 0 : index
    %c0_12 = arith.constant 0 : index
    %37 = memref.load %arg3[%c0_11, %c0_12] : memref<1x1xf32, #tpu.memory_space<smem>>
    memref.store %36, %arg3[%c0_11, %c0_12] : memref<1x1xf32, #tpu.memory_space<smem>>
    return
  }
  func.func @transform_0(%arg0: i32) -> (i32, i32) {
    %c0_i32 = arith.constant 0 : i32
    %c0_i32_0 = arith.constant 0 : i32
    return %c0_i32, %arg0 : i32, i32
  }
  func.func @transform_1(%arg0: i32) -> (i32, i32) {
    %c0_i32 = arith.constant 0 : i32
    %c0_i32_0 = arith.constant 0 : i32
    return %c0_i32, %arg0 : i32, i32
  }
  func.func @transform_2(%arg0: i32) -> (i32, i32) {
    %c0_i32 = arith.constant 0 : i32
    %c0_i32_0 = arith.constant 0 : i32
    return %arg0, %c0_i32 : i32, i32
  }
}

</mosaic_0001>

<bundles_post_ra>
// kernel: tpu_custom_call.1
= control target key start
LH: loop header
LB: loop body
LE: loop exit
PB: predicated region body
PF: predicated region fallthrough
CT: control target
= control target key end

     0   :  { %7 = vsyncpa [#allocation3], 0  ;;  %s199_s0 = inlined_call_operand.hbm [shape: f32[10,16], index: 0, kind: input, shape index: {}]   ;;  %s200_s1 = inlined_call_operand.vmem [shape: s32[1,16], index: 1, kind: input, shape index: {}]   ;;  %s201_s2 = inlined_call_operand.hbm [shape: f32[1,1], index: 2, kind: output, shape index: {}]  }
   0x1   :  { %8 = vsyncpa [#allocation4], 0  ;;  %s165_s9 = smov [#allocation2]  }
   0x2   :  { %s14_s10 = sshll.u32 %s165_s9, 4  ;;  %s15_s10 = int_to_ptr.vmem [resolvable:$true] %s14_s10 }
   0x3   :  { %s141_s11 = scalar_lea.vmem %s15_s10, 256  ;;  %p146_p1 = scmp.lt.s32.totalorder %s15_s10, %s15_s10 }
   0x4   :  { %p142_p0 = scmp.ne.s32.totalorder %s15_s10, %s141_s11  ;;  %p147_p2 = scmp.lt.s32.totalorder %s141_s11, %s141_s11 }
   0x6   :  { %p148_p3 = por %p147_p2, %p146_p1 }
   0x8   :  { %p149_p4 = pnand %p148_p3, %p142_p0 }
   0xa   :  { %152 = shalt.err (!%p149_p4)
}
   0xb   :  { %s166_s12 = smov 128   ;;  %s167_s13 = smov 8  }
   0xc   :  { %20 = dma.hbm_to_vmem [thread:$0]  %s199_s0, 256, %s15_s10, [#allocation3], %s166_s12, %s166_s12, %s167_s13  }
   0xd   :  { %161 = dma.done.wait [#allocation3], 256  }
   0xe   :  { %162 = vsyncadd [#allocation3], 4294967040  ;;  %vm28_vm0 = vcmask 130048   ;;  %vm30_vm1 = vcmask 123904   ;;  %v26_v0 = vld [vmem:[#allocation2] sm:$0xff]  ;;  %v57_v13 = vlaneseq  ;;  %vm91_vm5 = vcmask 122880  }
   0xf   :  { %v27_v1 = vld [vmem:[#allocation2 + $0x8] sm:$0x3]  ;;  %v29_v2 = vsel %vm28_vm0, %v26_v0, -inf  ;;  %v118_v18 = vld [vmem:[%s200_s1] ss:$0 sm:$0xff]  ;;  %s168_s17 = smov [#allocation5]  }
  0x10   :  { %v31_v3 = vsel %vm30_vm1, %v27_v1, -inf  ;;  %v58_v16 = vshrl.u32 %v57_v13, 7  ;;  %v86_v47 = vand.u32 127, %v57_v13 }
  0x11   :  { %v32_v4 = vmax.f32 %v29_v2, %v31_v3 }
  0x12   :  { %v59_v17 = vadd.s32 8, %v58_v16  ;;  %vm64_vm2 = vcmp.eq.s32.totalorder %v58_v16, %v118_v18  ;;  %vm89_vm4 = vcmp.lt.s32.totalorder %v86_v47, 16 }
  0x13   :  { %v33_v5 = vrot.slane %v32_v4, 4 }
  0x14   :  { %vm65_vm3 = vcmp.eq.s32.totalorder %v59_v17, %v118_v18 }
  0x15   :  { %v34_v6 = vmax.f32 %v32_v4, %v33_v5 }
  0x17   :  { %v35_v7 = vrot.slane %v34_v6, 2 }
  0x19   :  { %v36_v8 = vmax.f32 %v34_v6, %v35_v7 }
  0x1b   :  { %v37_v9 = vrot.slane %v36_v8, 1 }
  0x1d   :  { %v38_v10 = vmax.f32 %v36_v8, %v37_v9 }
  0x1f   :  { %v39_v11 = vsub.f32 %v26_v0, %v38_v10  ;;  %v40_v12 = vsub.f32 %v27_v1, %v38_v10 }
  0x21   :  { %v41_v14 = vmul.f32 1.442695, %v39_v11  ;;  %v43_v15 = vmul.f32 1.442695, %v40_v12  ;;  %v66_v19 = vsel %vm64_vm2, %v39_v11, 0.0  ;;  %v67_v20 = vsel %vm65_vm3, %v40_v12, 0.0 }
  0x22   :  { %v68_v25 = vsel %vm28_vm0, %v66_v19, 0.0  ;;  %v69_v26 = vsel %vm30_vm1, %v67_v20, 0.0 }
  0x23   :  { %125 = vpow2.f32 %v41_v14  ;;  %v70_v29 = vadd.f32 %v69_v26, %v68_v25 }
  0x24   :  { %127 = vpow2.f32 %v43_v15 }
  0x25   :  { %v71_v32 = vrot.slane %v70_v29, 4 }
  0x27   :  { %v72_v35 = vadd.f32 %v71_v32, %v70_v29 }
  0x29   :  { %v73_v37 = vrot.slane %v72_v35, 2 }
  0x2b   :  { %v74_v38 = vadd.f32 %v73_v37, %v72_v35 }
  0x2d   :  { %v75_v39 = vrot.slane %v74_v38, 1 }
  0x2f   :  { %v76_v40 = vadd.f32 %v75_v39, %v74_v38 }
  0x30   :  { %v126_v21 = vpop.eup %125 }
  0x31   :  { %v128_v22 = vpop.eup %127  ;;  %v45_v23 = vsel %vm28_vm0, %v126_v21, 0.0 }
  0x32   :  { %v46_v24 = vsel %vm30_vm1, %v128_v22, 0.0 }
  0x33   :  { %v47_v27 = vadd.f32 %v46_v24, %v45_v23 }
  0x35   :  { %v48_v28 = vrot.slane %v47_v27, 4 }
  0x37   :  { %v49_v30 = vadd.f32 %v48_v28, %v47_v27 }
  0x39   :  { %v50_v31 = vrot.slane %v49_v30, 2 }
  0x3b   :  { %v51_v33 = vadd.f32 %v50_v31, %v49_v30 }
  0x3d   :  { %v52_v34 = vrot.slane %v51_v33, 1 }
  0x3f   :  { %v53_v36 = vadd.f32 %v52_v34, %v51_v33 }
  0x41   :  { %129 = vlog2.f32 %v53_v36 }
  0x4e   :  { %v130_v41 = vpop.eup %129 }
  0x4f   :  { %v55_v42 = vmul.f32 0.6931472, %v130_v41 }
  0x51   :  { %v77_v43 = vsub.f32 %v76_v40, %v55_v42 }
  0x53   :  { %v78_v44 = vmul.f32 1.442695, %v77_v43 }
  0x55   :  { %131 = vpow2.f32 %v78_v44 }
  0x62   :  { %v132_v45 = vpop.eup %131 }
  0x63   :  { %v80_v46 = vsub.f32 1.0, %v132_v45 }
  0x65   :  { %v81_v48 = vmul.f32 %v80_v46, %v80_v46 }
  0x67   :  { %v82_v49 = vsub.f32 0.0, %v81_v48 }
  0x69   :  { %v83_v50 = vmul.f32 %v82_v49, %v77_v43 }
  0x6b   :  { %v90_v51 = vsel %vm89_vm4, %v83_v50, 0.0 }
  0x6c   :  { %v92_v52 = vsel %vm91_vm5, %v90_v51, 0.0 }
  0x6d   :  { %93 = vadd.xlane.f32.xlu0 %v92_v52 }
  0xf6   :  { %v94_v53 = vpop.xlane.xlu0 %93 }
  0xf7   :  { %v95_v54 = vrot.slane %v94_v53, 4 }
  0xf9   :  { %v96_v55 = vadd.f32 %v95_v54, %v94_v53 }
  0xfb   :  { %v97_v56 = vrot.slane %v96_v55, 2 }
  0xfd   :  { %v98_v57 = vadd.f32 %v97_v56, %v96_v55 }
  0xff   :  { %v99_v58 = vrot.slane %v98_v57, 1 }
 0x101   :  { %v100_v59 = vadd.f32 %v99_v58, %v98_v57 }
 0x103   :  { %119 = vpush %v100_v59 }
 0x134   :  { %s120_s1 = spop %119 }
 0x135   :  { %103 = sst [smem:[#allocation5]] %s120_s1 }
 0x136   :  { %111 = dma.smem_to_hbm %s168_s17, 16, %s201_s2, [#allocation4]  }
 0x137   :  { %163 = dma.done.wait [#allocation4], 16  }
 0x138   :  { %164 = vsyncadd [#allocation4], 4294967280 }
 0x139   :  { %115 = sfence }
 0x13a   :  { %116 = vsyncpa [#allocation3], 1 }
 0x13b   :  { %117 = vsyncpa [#allocation4], 1 }

</bundles_post_ra>
